<compile_context>
chip_gen: v7x
topology: tpu7x:2x2x1
jax: 0.10.0
libtpu: 0.0.40
codegen_flags: <defaults>
</compile_context>

<pallas_src>
import functools

import jax
import jax.numpy as jnp
from jax.experimental import pallas as pl
from jax.experimental.pallas import tpu as pltpu


def _round_up(x, m):
    return ((x + m - 1) // m) * m


# ---------------------------------------------------------------------------
# Kernel (transposed layout: features/concepts/hidden on sublanes, pixels on
# lanes).
#
#   x      : (D, P) f32   pixel columns
#   inv_l2 : (1, P)       rsqrt(sum_d x^2)
#   tp     : (C, P)       Wc_n @ x                (f32, precision=HIGHEST)
#   tpn    : tp * inv_l2                          == (x/||x||) @ Wc_n^T
#   am     : where(tpn > thres, tp, 0)
#   nn     : am * recip(sum_c |am|)               (L1 normalize over concepts)
#   h      : relu(W1_aug @ [nn; 1])  -> bf16      (b1 folded into W1_aug)
#   out    : W2_aug @ h                            (b2 on constant spare unit)
# ---------------------------------------------------------------------------
def _topic_kernel(x_ref, wc_ref, w1_ref, w2_ref, o_ref, *,
                  thres, hw, tile_p, ragged):
    eps = 1e-12  # matches torch.nn.functional.normalize default eps

    x = x_ref[...]                                          # (D, P) f32
    if ragged:
        # Ragged last pixel block: zero the out-of-bounds lanes so whatever the
        # clipped input DMA left in the buffer (possibly NaN/Inf) never reaches
        # ssq / l1.  Only emitted when HW is not a multiple of tile_p.
        col = pl.program_id(1) * tile_p + jax.lax.broadcasted_iota(
            jnp.int32, (1, tile_p), 1)
        x = jnp.where(col < hw, x, 0.0)

    ssq = jnp.sum(x * x, axis=0, keepdims=True)             # (1, P)
    inv_l2 = jax.lax.rsqrt(jnp.maximum(ssq, eps * eps))     # 1 / max(||x||, eps)

    # Concept matmul at HIGHEST precision: the threshold mask must track the
    # f32 reference (default precision rounds MXU operands to bf16).
    tp = jnp.dot(wc_ref[...], x, preferred_element_type=jnp.float32,
                 precision=jax.lax.Precision.HIGHEST)       # (C, P)
    tpn = tp * inv_l2                                       # normalized topic prob
    am = jnp.where(tpn > thres, tp, 0.0)                    # masked topic prob

    l1 = jnp.sum(jnp.abs(am), axis=0, keepdims=True)        # (1, P)
    inv_l1 = pl.reciprocal(jnp.maximum(l1, eps), approx=True)   # EUP, ~free
    nn_ = am * inv_l1                                        # (C, P) f32

    # fc1: bias folded -> append a constant ones row; both operands bf16,
    # f32 accumulation on the MXU.
    ones = jnp.ones((1, tile_p), jnp.float32)
    nn_aug = jnp.concatenate([nn_, ones], axis=0).astype(jnp.bfloat16)  # (C+1, P)
    h = jnp.dot(w1_ref[...], nn_aug, preferred_element_type=jnp.float32)
    # Fuse ReLU + bf16 cast so h only ever lives as bf16 in VMEM (the f32
    # (HID_pad, P) round-trip was the binding vld/vst cost).  The extra
    # functional.relu in the module is idempotent.
    h = jnp.maximum(h, 0.0).astype(jnp.bfloat16)             # (HID_pad, P) bf16

    # fc2: b2 arrives via the spare constant-1 hidden unit baked into w2_aug.
    out = jnp.dot(w2_ref[...], h, preferred_element_type=jnp.float32)   # (D, P)
    o_ref[...] = out.astype(o_ref.dtype)


def topic_model_forward(f_train, wc, w1, b1, w2, b2, thres, *, tile_p=None):
    """f_train: (B, feat_depth, H, W) NCHW float32.
       wc: (n_concept, feat_depth)   [nn.Linear(feat_depth, n_concept, bias=False).weight]
       w1: (500, n_concept), b1: (500,)          [rec_1 Linear]
       w2: (feat_depth, 500), b2: (feat_depth,)  [rec_2 Linear]
       thres: Python float (static; baked into the kernel).
       Returns (B, feat_depth, H, W) float32."""
    B, D, H, W = f_train.shape
    C = wc.shape[0]
    HID = w1.shape[0]
    C_aug = C + 1                         # +1 column/row for the folded b1
    HID_pad = _round_up(HID + 1, 128)     # 500 -> 512; guarantees a spare unit

    # --- weight prep (small XLA glue on weights only) ------------------------
    # L2-normalize concept rows (the module does this every forward).
    wc_n = wc / jnp.maximum(
        jnp.sqrt(jnp.sum(wc * wc, axis=1, keepdims=True)), 1e-12)       # (C, D)

    # W1_aug = [w1 | b1] with a spare unit whose pre-activation is exactly 1.
    w1_aug = jnp.zeros((HID_pad, C_aug), jnp.float32)
    w1_aug = w1_aug.at[:HID, :C].set(w1)
    w1_aug = w1_aug.at[:HID, C].set(b1)        # b1 folded into the ones column
    w1_aug = w1_aug.at[HID, C].set(1.0)        # spare unit: relu(1) == 1
    w1_aug = w1_aug.astype(jnp.bfloat16)

    # W2_aug = [w2 | b2-on-spare-unit | 0...].
    w2_aug = jnp.zeros((D, HID_pad), jnp.float32)
    w2_aug = w2_aug.at[:, :HID].set(w2)
    w2_aug = w2_aug.at[:, HID].set(b2)         # b2 rides on the constant unit
    w2_aug = w2_aug.astype(jnp.bfloat16)

    # --- activations: keep NCHW, pixels on lanes; NO pad, NO output slice ----
    HW = H * W
    x = f_train.reshape(B, D, HW)

    # --- chip-aware tile / VMEM budgeting ------------------------------------
    try:
        phys_vmem = int(pltpu.get_tpu_info().vmem_capacity_bytes)
    except Exception:
        phys_vmem = 64 * 1024 * 1024                 # conservative (v7x-sized)
    big_vmem = phys_vmem >= 100 * 1024 * 1024        # 128 MiB v5e/v6e vs 64 MiB v7x

    if tile_p is None:
        if D >= 1024:
            tile_p = 1024 if big_vmem else 512       # keep blocks inside VMEM
        else:
            tile_p = 2048 if big_vmem else 1024      # amortize per-step overhead
    tile_p = min(tile_p, _round_up(HW, 128))         # don't over-tile tiny maps
    tile_p = max(128, _round_up(tile_p, 128))        # lane granule is 128

    n_pix = -(-HW // tile_p)
    if not big_vmem:
        # 64 MiB parts (v7x) have 2 TensorCores: keep >= 4 grid steps so both
        # cores get work via the "parallel" axes.
        while B * n_pix < 4 and tile_p > 128:
            tile_p = max(128, _round_up(tile_p // 2, 128))
            n_pix = -(-HW // tile_p)
    ragged = (HW % tile_p) != 0

    # Constant-index weight operands: single-buffer once they are big enough
    # to matter (reclaims several MiB under v7x's 64 MiB budget).
    single_buf_weights = D >= 1024

    def _w_spec(shape):
        if single_buf_weights:
            return pl.BlockSpec(shape, lambda b, p: (0, 0),
                                pipeline_mode=pl.Buffered(1))
        return pl.BlockSpec(shape, lambda b, p: (0, 0))

    # VMEM budget from actual block sizes (+ margin), capped inside physical.
    act_bufs = 2 * 2 * D * tile_p * 4                          # x + out, 2-deep
    wt_bytes = C * D * 4 + HID_pad * C_aug * 2 + D * HID_pad * 2
    wt_bufs = wt_bytes * (1 if single_buf_weights else 2)
    interm = 4 * C_aug * tile_p * 4 + HID_pad * tile_p * 6     # tp/am/nn + h
    est = act_bufs + wt_bufs + interm
    vmem_limit = int(max(32 * 1024 * 1024,
                         min(int(0.75 * phys_vmem),
                             2 * est + 8 * 1024 * 1024)))

    # TODO(synk): thres is baked in as a Python float; pass via SMEM scalar
    # prefetch if it ever needs to be traced.
    kernel = functools.partial(_topic_kernel, thres=float(thres), hw=HW,
                               tile_p=tile_p, ragged=ragged)

    out = pl.pallas_call(
        kernel,
        out_shape=jax.ShapeDtypeStruct((B, D, HW), jnp.float32),
        grid_spec=pltpu.PrefetchScalarGridSpec(
            num_scalar_prefetch=0,
            grid=(B, n_pix),                      # both axes independent
            in_specs=[
                # activations: (D, tile_p) block, batch dim squeezed
                pl.BlockSpec((None, D, tile_p), lambda b, p: (b, 0, p)),
                _w_spec((C, D)),                  # Wc_n   (f32)
                _w_spec((HID_pad, C_aug)),        # W1|b1  (bf16)
                _w_spec((D, HID_pad)),            # W2|b2  (bf16)
            ],
            out_specs=pl.BlockSpec((None, D, tile_p), lambda b, p: (b, 0, p)),
        ),
        compiler_params=pltpu.CompilerParams(
            dimension_semantics=("parallel", "parallel"),
            vmem_limit_bytes=vmem_limit,
        ),
    )(x, wc_n, w1_aug, w2_aug)

    return out.reshape(B, D, H, W)    # NCHW already; reshape is free


# ---------------------------------------------------------------------------
# Pure-JAX reference mirroring the PyTorch forward exactly (f32 everywhere;
# HIGHEST precision so XLA does not silently round operands to bf16).
# ---------------------------------------------------------------------------
def topic_model_reference(f_train, wc, w1, b1, w2, b2, thres):
    eps = 1e-12
    hp = jax.lax.Precision.HIGHEST
    wc_n = wc / jnp.maximum(jnp.linalg.norm(wc, axis=1, keepdims=True), eps)
    f_in = jnp.transpose(f_train, (0, 2, 3, 1))
    f_in_n = f_in / jnp.maximum(jnp.linalg.norm(f_in, axis=3, keepdims=True), eps)
    tp = jnp.matmul(f_in, wc_n.T, precision=hp)
    tpn = jnp.matmul(f_in_n, wc_n.T, precision=hp)
    mask = (tpn > thres).astype(jnp.float32)
    am = tp * mask
    nn_ = am / jnp.maximum(jnp.sum(jnp.abs(am), axis=3, keepdims=True), eps)
    h = jnp.maximum(jnp.matmul(nn_, w1.T, precision=hp) + b1, 0.0)
    out = jnp.matmul(h, w2.T, precision=hp) + b2
    return jnp.transpose(out, (0, 3, 1, 2))


if __name__ == "__main__":
    # Small shapes consistent with the module; W=10 exercises the ragged
    # (HW not a tile multiple) path.
    B, feat_depth, H, W = 2, 32, 16, 10
    n_concept = 8
    hidden = 500
    thres = 0.2

    key = jax.random.PRNGKey(0)
    k0, k1, k2, k3, k4, k5 = jax.random.split(key, 6)

    f_train = jax.random.normal(k0, (B, feat_depth, H, W), dtype=jnp.float32)

    # Deterministic synthetic parameters (nn.Linear weight conventions).
    wc = jax.random.normal(k1, (n_concept, feat_depth), dtype=jnp.float32) * 0.2
    w1 = jax.random.normal(k2, (hidden, n_concept), dtype=jnp.float32) * 0.1
    b1 = jax.random.normal(k3, (hidden,), dtype=jnp.float32) * 0.05
    w2 = jax.random.normal(k4, (feat_depth, hidden), dtype=jnp.float32) * 0.05
    b2 = jax.random.normal(k5, (feat_depth,), dtype=jnp.float32) * 0.05

    out = topic_model_forward(f_train, wc, w1, b1, w2, b2, thres)
    out = jax.block_until_ready(out)

    ref = topic_model_reference(f_train, wc, w1, b1, w2, b2, thres)
    ref = jax.block_until_ready(ref)

    assert out.shape == (B, feat_depth, H, W)
    # Tolerance covers the intentional bf16 fc1/fc2 operands (f32 accumulation),
    # bf16-stored b2, and the approximate L1 reciprocal.
    assert bool(jnp.allclose(out, ref, atol=1e-2, rtol=1e-2)), "mismatch vs reference"

    print("KERNEL_OK")
</pallas_src>

<mosaic_0001>
module attributes {stable_mosaic.version = 11 : i64} {
  func.func @_topic_kernel(%arg0: i32, %arg1: i32, %arg2: memref<1x32x128xf32, #tpu.memory_space<vmem>>, %arg3: memref<8x32xf32, #tpu.memory_space<vmem>>, %arg4: memref<512x9xbf16, #tpu.memory_space<vmem>>, %arg5: memref<32x512xbf16, #tpu.memory_space<vmem>>, %arg6: memref<1x32x128xf32, #tpu.memory_space<vmem>>) attributes {dimension_semantics = [#tpu.dimension_semantics<parallel>, #tpu.dimension_semantics<parallel>], iteration_bounds = array<i64: 2, 2>, scalar_prefetch = 0 : i64, scratch_operands = 0 : i64, tpu.core_type = #tpu.core_type<tc>, window_params = [{transform_indices = @transform_0, window_bounds = array<i64: 1, 32, 128>}, {pipeline_mode = #tpu.pipeline_mode<synchronous>, transform_indices = @transform_1, window_bounds = array<i64: 8, 32>}, {pipeline_mode = #tpu.pipeline_mode<synchronous>, transform_indices = @transform_2, window_bounds = array<i64: 512, 9>}, {pipeline_mode = #tpu.pipeline_mode<synchronous>, transform_indices = @transform_3, window_bounds = array<i64: 32, 512>}, {transform_indices = @transform_4, window_bounds = array<i64: 1, 32, 128>}]} {
    %c0 = arith.constant 0 : index
    %c0_0 = arith.constant 0 : index
    %c0_1 = arith.constant 0 : index
    %0 = vector.load %arg2[%c0, %c0_0, %c0_1] : memref<1x32x128xf32, #tpu.memory_space<vmem>>, vector<1x32x128xf32>
    %1 = vector.shape_cast %0 : vector<1x32x128xf32> to vector<32x128xf32>
    %c128_i32 = arith.constant 128 : i32
    %2 = arith.muli %arg1, %c128_i32 : i32
    %3 = tpu.iota {dimensions = array<i32: 1>} : vector<1x128xi32>
    %4 = vector.broadcast %2 : i32 to vector<1x128xi32>
    %5 = arith.addi %4, %3 : vector<1x128xi32>
    %c160_i32 = arith.constant 160 : i32
    %6 = vector.broadcast %c160_i32 : i32 to vector<1x128xi32>
    %7 = arith.cmpi slt, %5, %6 : vector<1x128xi32>
    %cst = arith.constant 0.000000e+00 : f32
    %8 = vector.shape_cast %7 : vector<1x128xi1> to vector<1x128xi1>
    %9 = vector.broadcast %8 : vector<1x128xi1> to vector<32x128xi1>
    %10 = vector.broadcast %cst : f32 to vector<32x128xf32>
    %11 = arith.select %9, %1, %10 : vector<32x128xi1>, vector<32x128xf32>
    %12 = arith.mulf %11, %11 : vector<32x128xf32>
    %cst_2 = arith.constant dense<0.000000e+00> : vector<128xf32>
    %13 = vector.multi_reduction <add>, %12, %cst_2 [0] : vector<32x128xf32> to vector<128xf32>
    %14 = vector.shape_cast %13 : vector<128xf32> to vector<1x128xf32>
    %cst_3 = arith.constant 1.000000e-24 : f32
    %15 = vector.broadcast %cst_3 : f32 to vector<1x128xf32>
    %16 = arith.maximumf %14, %15 : vector<1x128xf32>
    %17 = math.rsqrt %16 : vector<1x128xf32>
    %c0_4 = arith.constant 0 : index
    %c0_5 = arith.constant 0 : index
    %18 = vector.load %arg3[%c0_4, %c0_5] : memref<8x32xf32, #tpu.memory_space<vmem>>, vector<8x32xf32>
    %cst_6 = arith.constant dense<0.000000e+00> : vector<8x128xf32>
    %19 = tpu.matmul %18, %11, %cst_6 {dimension_numbers = #tpu.dot_dimension_numbers<[1], [0], [0], [1], [0, 0, 1, 1], [], []>, precision = #tpu.contract_precision<fp32>} : vector<8x32xf32>, vector<32x128xf32>, vector<8x128xf32> -> vector<8x128xf32>
    %20 = vector.broadcast %17 : vector<1x128xf32> to vector<8x128xf32>
    %21 = arith.mulf %19, %20 : vector<8x128xf32>
    %cst_7 = arith.constant 2.000000e-01 : f32
    %22 = vector.broadcast %cst_7 : f32 to vector<8x128xf32>
    %23 = arith.cmpf ogt, %21, %22 : vector<8x128xf32>
    %cst_8 = arith.constant 0.000000e+00 : f32
    %24 = vector.broadcast %cst_8 : f32 to vector<8x128xf32>
    %25 = arith.select %23, %19, %24 : vector<8x128xi1>, vector<8x128xf32>
    %26 = math.absf %25 : vector<8x128xf32>
    %cst_9 = arith.constant dense<0.000000e+00> : vector<128xf32>
    %27 = vector.multi_reduction <add>, %26, %cst_9 [0] : vector<8x128xf32> to vector<128xf32>
    %28 = vector.shape_cast %27 : vector<128xf32> to vector<1x128xf32>
    %cst_10 = arith.constant 9.99999996E-13 : f32
    %29 = vector.broadcast %cst_10 : f32 to vector<1x128xf32>
    %30 = arith.maximumf %28, %29 : vector<1x128xf32>
    %31 = tpu.reciprocal %30 {approx = true} : vector<1x128xf32> -> vector<1x128xf32>
    %32 = vector.broadcast %31 : vector<1x128xf32> to vector<8x128xf32>
    %33 = arith.mulf %25, %32 : vector<8x128xf32>
    %cst_11 = arith.constant 1.000000e+00 : f32
    %34 = vector.broadcast %cst_11 : f32 to vector<1x128xf32>
    %35 = tpu.concatenate %33, %34 in 0 : vector<8x128xf32>, vector<1x128xf32> -> vector<9x128xf32>
    %36 = arith.truncf %35 : vector<9x128xf32> to vector<9x128xbf16>
    %c0_12 = arith.constant 0 : index
    %c0_13 = arith.constant 0 : index
    %37 = vector.load %arg4[%c0_12, %c0_13] : memref<512x9xbf16, #tpu.memory_space<vmem>>, vector<512x9xbf16>
    %cst_14 = arith.constant dense<0.000000e+00> : vector<512x128xf32>
    %38 = tpu.matmul %37, %36, %cst_14 {dimension_numbers = #tpu.dot_dimension_numbers<[1], [0], [0], [1], [0, 0, 1, 1], [], []>} : vector<512x9xbf16>, vector<9x128xbf16>, vector<512x128xf32> -> vector<512x128xf32>
    %cst_15 = arith.constant 0.000000e+00 : f32
    %39 = vector.broadcast %cst_15 : f32 to vector<512x128xf32>
    %40 = arith.maximumf %38, %39 : vector<512x128xf32>
    %41 = arith.truncf %40 : vector<512x128xf32> to vector<512x128xbf16>
    %c0_16 = arith.constant 0 : index
    %c0_17 = arith.constant 0 : index
    %42 = vector.load %arg5[%c0_16, %c0_17] : memref<32x512xbf16, #tpu.memory_space<vmem>>, vector<32x512xbf16>
    %cst_18 = arith.constant dense<0.000000e+00> : vector<32x128xf32>
    %43 = tpu.matmul %42, %41, %cst_18 {dimension_numbers = #tpu.dot_dimension_numbers<[1], [0], [0], [1], [0, 0, 1, 1], [], []>} : vector<32x512xbf16>, vector<512x128xbf16>, vector<32x128xf32> -> vector<32x128xf32>
    %c0_19 = arith.constant 0 : index
    %c0_20 = arith.constant 0 : index
    %c0_21 = arith.constant 0 : index
    %44 = vector.load %arg6[%c0_19, %c0_20, %c0_21] : memref<1x32x128xf32, #tpu.memory_space<vmem>>, vector<1x32x128xf32>
    %45 = vector.shape_cast %44 : vector<1x32x128xf32> to vector<32x128xf32>
    %46 = vector.shape_cast %43 : vector<32x128xf32> to vector<1x32x128xf32>
    tpu.vector_store %arg6[%c0_19, %c0_20, %c0_21], %46 {strides = array<i32>} : memref<1x32x128xf32, #tpu.memory_space<vmem>>, vector<1x32x128xf32>,
    return
  }
  func.func @transform_0(%arg0: i32, %arg1: i32) -> (i32, i32, i32) {
    %c0_i32 = arith.constant 0 : i32
    %c0_i32_0 = arith.constant 0 : i32
    return %arg0, %c0_i32, %arg1 : i32, i32, i32
  }
  func.func @transform_1(%arg0: i32, %arg1: i32) -> (i32, i32) {
    %c0_i32 = arith.constant 0 : i32
    %c0_i32_0 = arith.constant 0 : i32
    %c0_i32_1 = arith.constant 0 : i32
    return %c0_i32, %c0_i32_0 : i32, i32
  }
  func.func @transform_2(%arg0: i32, %arg1: i32) -> (i32, i32) {
    %c0_i32 = arith.constant 0 : i32
    %c0_i32_0 = arith.constant 0 : i32
    %c0_i32_1 = arith.constant 0 : i32
    return %c0_i32, %c0_i32_0 : i32, i32
  }
  func.func @transform_3(%arg0: i32, %arg1: i32) -> (i32, i32) {
    %c0_i32 = arith.constant 0 : i32
    %c0_i32_0 = arith.constant 0 : i32
    %c0_i32_1 = arith.constant 0 : i32
    return %c0_i32, %c0_i32_0 : i32, i32
  }
  func.func @transform_4(%arg0: i32, %arg1: i32) -> (i32, i32, i32) {
    %c0_i32 = arith.constant 0 : i32
    %c0_i32_0 = arith.constant 0 : i32
    return %arg0, %c0_i32, %arg1 : i32, i32, i32
  }
}

</mosaic_0001>

<bundles_post_ra>
// kernel: tpu_custom_call.1
= control target key start
LH: loop header
LB: loop body
LE: loop exit
PB: predicated region body
PF: predicated region fallthrough
CT: control target
= control target key end

     0   :  { %9 = vsyncpa [#allocation4], 0  ;;  %s2748_s0 = inlined_call_operand.vmem [shape: f32[2,32,160], index: 0, kind: input, shape index: {}]   ;;  %s2749_s1 = inlined_call_operand.vmem [shape: f32[8,32], index: 1, kind: input, shape index: {}]   ;;  %s2750_s2 = inlined_call_operand.vmem [shape: bf16[512,9], index: 2, kind: input, shape index: {}]   ;;  %s2751_s3 = inlined_call_operand.vmem [shape: bf16[32,512], index: 3, kind: input, shape index: {}]   ;;  %s2752_s4 = inlined_call_operand.hbm [shape: f32[2,32,160], index: 4, kind: output, shape index: {}]  }
   0x1   :  { %11 = vsyncpa [#allocation4 + $0x1], 0  ;;  %s2399_s15 = smov 0   ;;  %s2401_s16 = smov 0  }
   0x2   :  { %s2403_s17 = smov 0   ;;  %s2405_s18 = smov 0  }
   0x3   :  { %s2407_s19 = smov 0   ;;  %s2409_s20 = smov 0  }
   0x4   :  { %s2411_s21 = smov 0   ;;  %s2413_s22 = smov 0  }
   0x5 LB: > { %s1757_s23 = sadd.s32 4294967295, %s2363_s22   ;;  %s1758_s24 = sadd.s32 4294967294, %s2363_s22   ;;  %s2363_s22 = sphi %s2413_s22, %s17_s22   ;;  %s2359_s21 = sphi %s2411_s21, %s2762_s21   ;;  %s2355_s20 = sphi %s2409_s20, %s2761_s20   ;;  %s2351_s19 = sphi %s2407_s19, %s2760_s19   ;;  %s2347_s18 = sphi %s2405_s18, %s2759_s18   ;;  %s2343_s17 = sphi %s2403_s17, %s2758_s17   ;;  %s2339_s16 = sphi %s2401_s16, %s2757_s16   ;;  %s2335_s15 = sphi %s2399_s15, %s2756_s15  }
   0x6   : > { %s26_s25 = sadd.s32 1, %s2355_s20  ;;  %s29_s26 = sadd.s32 1, %s2359_s21 }
   0x7   : > { %p27_p0 = scmp.ge.s32.totalorder %s26_s25, 2  ;;  %p45_p1 = scmp.ne.s32.totalorder %s2343_s17, %s2339_s16 }
   0x8   : > { %p46_p2 = scmp.eq.s32.totalorder %s2363_s22, 0  ;;  %p140_p5 = scmp.eq.s32.totalorder %s1757_s23, 3 }
   0x9   : > { %s2764_s25 = smov (%p27_p0, %s26_s25), 0  ;;  %s2766_s26 = smov (!%p27_p0, %s29_s26), %s2359_s21 }
   0xa   : > { %s34_s27 = ssub.s32 %s2355_s20, %s2764_s25  ;;  %p2451_p3 = por %p46_p2, %p45_p1 }
   0xb   : > { %p31_p4 = scmp.ge.s32.totalorder %s2766_s26, 2  ;;  %p145_p6 = scmp.ne.s32.totalorder %s2339_s16, %s2335_s15 }
   0xc   : > { %p146_p7 = scmp.eq.s32.totalorder %s1758_s24, 3  ;;  %p2459_p8 = por %p140_p5, %p45_p1 }
   0xd   : > { %s2768_s26 = smov (%p31_p4, %s2766_s26), 0  ;;  %s38_s7 = sadd.s32 1, %s2343_s17 }
   0xe   : > { %p2463_p9 = por %p146_p7, %p145_p6  ;;  %s33_s5 = ssub.s32 %s2359_s21, %s2768_s26 }
   0xf   : > { %s35_s6 = sor.u32 %s34_s27, %s33_s5  ;;  %p1760_p11 = scmp.ge.s32.totalorder %s2363_s22, 4 }
  0x10   : > { %p36_p10 = scmp.eq.s32.totalorder %s35_s6, 0 }
  0x11   : > { %171 = sbr.rel (%p1760_p11) target bundleno = 32 (0x20), region = 28 }
  0x12   : > { %s2471_s8 = scalar_select %p36_p10, %s2343_s17, %s38_s7  }
  0x18   : > { %174 = sbr.rel (!%p2451_p3) target bundleno = 32 (0x20), region = 32  ;;  %s176_s9 = sand.u32 (%p2451_p3), 1, %s2343_s17  }
  0x19   : > { %s1762_s10 = sshll.u32 (%p2451_p3), %s2359_s21, 3  ;;  %s1761_s11 = sshll.u32 (%p2451_p3), %s176_s9, 5 }
  0x1a   : > { %s180_s12 = sadd.s32 (%p2451_p3), %s2355_s20, %s1762_s10  ;;  %s178_s27 = scalar_lea.vmem (%p2451_p3), [#allocation2], %s1761_s11 }
  0x1b   : > { %s1763_s13 = sshll.u32 (%p2451_p3), %s180_s12, 3 }
  0x1c   : > { %s182_s24 = scalar_lea.vmem (%p2451_p3), %s2748_s0, %s1763_s13 }
  0x1d   : > { %v216_v0 = vld [vmem:[%s182_s24] sm:$0xff] (%p2451_p3)  ;;  %v218_v1 = vld [vmem:[%s182_s24 + $0x10] sm:$0xff] (%p2451_p3) }
  0x1e   : > { %v220_v2 = vld [vmem:[%s182_s24 + $0x20] sm:$0xff] (%p2451_p3)  ;;  %217 = vst [vmem:[%s178_s27] sm:$0xff] (%p2451_p3), %v216_v0  ;;  %219 = vst [vmem:[%s178_s27 + $0x8] sm:$0xff] (%p2451_p3), %v218_v1  ;;  %v222_v3 = vld [vmem:[%s182_s24 + $0x30] sm:$0xff] (%p2451_p3) }
  0x1f   : > { %221 = vst [vmem:[%s178_s27 + $0x10] sm:$0xff] %v220_v2  ;;  %223 = vst [vmem:[%s178_s27 + $0x18] sm:$0xff] %v222_v3 }
  0x20 PF: > { %p1764_p12 = scmp.ge.s32.totalorder %s2363_s22, 1  ;;  %p228_p13 = scmp.lt.s32.totalorder %s2363_s22, 5 }
  0x22   : > { %p229_p0 = pnand %p1764_p12, %p228_p13 }
  0x23   : > { %s235_s28 = sand.u32 (!%p229_p0), 1, %s2339_s16   ;;  %s1767_s5 = sshll.u32 (!%p229_p0), %s2347_s18, 7  ;;  %v266_v4 = vlaneseq (!%p229_p0)  ;;  %v292_v5 = vld [vmem:[%s2749_s1] sm:$0xff] (!%p229_p0)  ;;  %v2365_v6 = vmov (!%p229_p0), 0.0|0.0   ;;  %vm2366_vm0 = vmmov (!%p229_p0), 0   ;;  %v2367_v8 = vmov (!%p229_p0), 0.0  }
  0x24   : > { %232 = sbr.rel (%p229_p0) target bundleno = 937 (0x3a9), region = 70  ;;  %2096 = vmatprep.subr.bf16.mxu0 (!%p229_p0), %v2365_v6  ;;  %s2492_s9 = sshll.u32 (!%p229_p0), %s235_s28, 5  ;;  %v268_v7 = vstv (!%p229_p0), %s1767_s5  ;;  %1972 = vmatprep.mubr.msk.f32.mxu0 (!%p229_p0), %vm2366_vm0, %v2367_v8  ;;  %vm293_vm1 = vcmask (!%p229_p0), 261120   ;;  %v2221_v60 = vld [vmem:[%s2750_s2] sm:$0xff] (!%p229_p0)   ;;  %vm1020_vm3 = vcmask (!%p229_p0), 72704   ;;  %vm1117_vm5 = vcmask (!%p229_p0), 1043456  }
  0x25   : > { %v267_v9 = vand.u32 (!%p229_p0), 127, %v266_v4  ;;  %v295_v10 = vsel (!%p229_p0), %vm293_vm1, %v292_v5, 0  ;;  %s237_s10 = scalar_lea.vmem (!%p229_p0), [#allocation2], %s2492_s9  ;;  %2032 = vmatprep.mubr.msk.bf16.mxu1 (!%p229_p0), %vm1020_vm3, %v2221_v60  ;;  %vm1118_vm6 = vcmask (!%p229_p0), 1044480   ;;  %s1841_s14 = sshll.u32 (!%p229_p0), %s2351_s19, 3 }
  0x26   : > { %v261_v11 = vld [vmem:[%s237_s10] sm:$0xff] (!%p229_p0)  ;;  %v262_v12 = vld [vmem:[%s237_s10 + $0x8] sm:$0xff] (!%p229_p0)  ;;  %v263_v13 = vld [vmem:[%s237_s10 + $0x10] sm:$0xff] (!%p229_p0)  ;;  %v2497_v14 = vand.u32 (!%p229_p0), 4294901760, %v295_v10  ;;  %s259_s23 = scalar_lea.vmem (!%p229_p0), [#allocation3], %s2492_s9  ;;  %s1671_s24 = sadd.s32 (!%p229_p0), %s2347_s18, %s1841_s14 }
  0x27   : > { %v269_v15 = vadd.s32 (!%p229_p0), %v268_v7, %v267_v9  ;;  %v264_v16 = vld [vmem:[%s237_s10 + $0x18] sm:$0xff] (!%p229_p0)  ;;  %s1674_s27 = sshll.u32 (!%p229_p0), %s259_s23, 4  ;;  %s1842_s5 = sshll.u32 (!%p229_p0), %s1671_s24, 7  ;;  %s2687_s27 = int_to_ptr.vmem [resolvable:$true] %s1674_s27 }
  0x28   : > { %v2500_v17 = vsub.f32 (!%p229_p0), %v295_v10, %v2497_v14  ;;  %s2692_s18 = scalar_lea.hbm (!%p229_p0), %s2752_s4, %s1842_s5  ;;  %s2696_s6 = scalar_lea.sflag (!%p229_p0), [#allocation4], %s235_s28 }
  0x29   : > { %vm270_vm2 = vcmp.lt.s32.totalorder (!%p229_p0), %v269_v15, 160  ;;  %s2269_s7 = scalar_lea.vmem (!%p229_p0), %s2687_s27, 512  ;;  %s2370_s10 = smov (!%p229_p0), [#allocation3]  }
  0x2a   : > { %v273_v18 = vsel (!%p229_p0), %vm270_vm2, %v261_v11, 0.0  ;;  %v274_v19 = vsel (!%p229_p0), %vm270_vm2, %v262_v12, 0.0  ;;  %v275_v20 = vsel (!%p229_p0), %vm270_vm2, %v263_v13, 0.0  ;;  %v276_v21 = vsel (!%p229_p0), %vm270_vm2, %v264_v16, 0.0  ;;  %p2270_p1 = scmp.ne.s32.totalorder (!%p229_p0), %s2687_s27, %s2269_s7  ;;  %s2273_s11 = sshll.u32 (!%p229_p0), %s2370_s10, 4  ;;  %s2274_s11 = int_to_ptr.vmem [resolvable:$false] %s2273_s11 }
  0x2b   : > { %v277_v22 = vmul.f32 %v273_v18, %v273_v18  ;;  %v278_v23 = vmul.f32 %v274_v19, %v274_v19  ;;  %v298_v24 = vand.u32 4294901760, %v273_v18  ;;  %v301_v25 = vand.u32 4294901760, %v274_v19  ;;  %s2275_s12 = scalar_lea.vmem %s2274_s11, 1024  ;;  %p2276_p4 = scmp.lt.s32.totalorder %s2687_s27, %s2274_s11 }
  0x2c   : > { %v279_v26 = vmul.f32 %v275_v20, %v275_v20  ;;  %v280_v27 = vmul.f32 %v276_v21, %v276_v21  ;;  %v304_v28 = vand.u32 4294901760, %v275_v20  ;;  %v307_v29 = vand.u32 4294901760, %v276_v21  ;;  %p2271_p2 = pnand %p2270_p1, %p2459_p8  ;;  %p2277_p5 = scmp.lt.s32.totalorder %s2275_s12, %s2269_s7 }
  0x2d   : > { %v281_v30 = vadd.f32 %v278_v23, %v277_v22  ;;  %v2097_v31 = vpack.c.bf16 %v301_v25, %v298_v24  ;;  %v378_v32 = vsub.f32 %v273_v18, %v298_v24  ;;  %v385_v33 = vsub.f32 %v274_v19, %v301_v25  ;;  %v2222_v25 = vld [vmem:[%s2750_s2 + $0x8] sm:$0xff]  }
  0x2e   : > { %v392_v34 = vsub.f32 %v275_v20, %v304_v28  ;;  %v399_v35 = vsub.f32 %v276_v21, %v307_v29  ;;  %v368_v36 = vand.u32 4294901760, %v2500_v17  ;;  %v2100_v38 = vpack.c.bf16 %v307_v29, %v304_v28  ;;  %v2225_v28 = vld [vmem:[%s2750_s2 + $0x20] sm:$0xff]   ;;  %v2226_v29 = vld [vmem:[%s2750_s2 + $0x28] sm:$0xff]   ;;  %p2272_p3 = pneg %p2271_p2  ;;  %p2278_p6 = por %p2277_p5, %p2276_p4 }
  0x2f   : > { %2098 = vmatpush3.bf16.msra.mxu0 %v2097_v31  ;;  %v282_v37 = vadd.f32 %v281_v30, %v279_v26  ;;  %v379_v39 = vand.u32 4294901760, %v378_v32  ;;  %v386_v40 = vand.u32 4294901760, %v385_v33  ;;  %v2109_v56 = vpack.c.bf16 %v385_v33, %v378_v32  ;;  %v2223_v26 = vld [vmem:[%s2750_s2 + $0x10] sm:$0xff]  }
  0x30   : > { %2099 = vmatprep.subr.bf16.mxu0 %v2365_v6  ;;  %v369_v41 = vsub.f32 %v2500_v17, %v368_v36  ;;  %v393_v42 = vand.u32 4294901760, %v392_v34  ;;  %v400_v43 = vand.u32 4294901760, %v399_v35  ;;  %v2112_v57 = vpack.c.bf16 %v399_v35, %v392_v34  ;;  %v2227_v30 = vld [vmem:[%s2750_s2 + $0x30] sm:$0xff]   ;;  %p2279_p7 = pnand %p2278_p6, %p2272_p3 }
  0x31   : > { %v283_v44 = vadd.f32 %v282_v37, %v280_v27  ;;  %v380_v45 = vsub.f32 %v378_v32, %v379_v39  ;;  %v387_v46 = vsub.f32 %v385_v33, %v386_v40  ;;  %v2121_v58 = vpack.c.bf16 %v386_v40, %v379_v39  ;;  %v2224_v27 = vld [vmem:[%s2750_s2 + $0x18] sm:$0xff]   ;;  %v2229_v32 = vld [vmem:[%s2750_s2 + $0x40] sm:$0xff]   ;;  %v2230_v33 = vld [vmem:[%s2750_s2 + $0x48] sm:$0xff]  }
  0x32   : > { %v370_v47 = vand.u32 4294901760, %v369_v41  ;;  %v394_v48 = vsub.f32 %v392_v34, %v393_v42  ;;  %v401_v49 = vsub.f32 %v399_v35, %v400_v43  ;;  %v2124_v59 = vpack.c.bf16 %v400_v43, %v393_v42  ;;  %v2231_v34 = vld [vmem:[%s2750_s2 + $0x50] sm:$0xff]   ;;  %v2232_v35 = vld [vmem:[%s2750_s2 + $0x58] sm:$0xff]   ;;  %v2234_v37 = vld [vmem:[%s2750_s2 + $0x68] sm:$0xff]  }
  0x33   : > { %2101 = vmatpush3.bf16.msra.mxu0 %v2100_v38  ;;  %v381_v50 = vand.u32 4294901760, %v380_v45  ;;  %v388_v51 = vand.u32 4294901760, %v387_v46  ;;  %v284_v61 = vrot.slane %v283_v44, 4  ;;  %v2369_v22 = vmov 1.0   ;;  %v2236_v39 = vld [vmem:[%s2750_s2 + $0x78] sm:$0xff]   ;;  %v2237_v40 = vld [vmem:[%s2750_s2 + $0x80] sm:$0xff]  }
  0x34   : > { %2102 = vmatprep.subr.bf16.mxu0 %v2365_v6  ;;  %v395_v52 = vand.u32 4294901760, %v394_v48  ;;  %v402_v53 = vand.u32 4294901760, %v401_v49  ;;  %v2238_v41 = vld [vmem:[%s2750_s2 + $0x88] sm:$0xff]   ;;  %v2239_v42 = vld [vmem:[%s2750_s2 + $0x90] sm:$0xff]   ;;  %v2240_v43 = vld [vmem:[%s2750_s2 + $0x98] sm:$0xff]  }
  0x35   : > { %v2103_v54 = vpack.c.bf16 %v388_v51, %v381_v50  ;;  %v285_v62 = vadd.f32 %v284_v61, %v283_v44  ;;  %v2241_v44 = vld [vmem:[%s2750_s2 + $0xa0] sm:$0xff]   ;;  %v2242_v45 = vld [vmem:[%s2750_s2 + $0xa8] sm:$0xff]   ;;  %v2243_v46 = vld [vmem:[%s2750_s2 + $0xb0] sm:$0xff]  }
  0x36   : > { %1973 = vmatmul.mubr.f32.vlgmr.msra.gmra.mrb[0].mxu0 %v370_v47  ;;  %v2106_v55 = vpack.c.bf16 %v402_v53, %v395_v52  ;;  %v2244_v47 = vld [vmem:[%s2750_s2 + $0xb8] sm:$0xff]   ;;  %v2245_v48 = vld [vmem:[%s2750_s2 + $0xc0] sm:$0xff]   ;;  %v2246_v49 = vld [vmem:[%s2750_s2 + $0xc8] sm:$0xff]  }
  0x37   : > { %2104 = vmatpush3.bf16.msra.mxu0 %v2103_v54  ;;  %1983 = vmatprep.mubr.msk.f32.mxu0 %vm2366_vm0, %v2367_v8  ;;  %v286_v63 = vrot.slane %v285_v62, 2  ;;  %v2247_v50 = vld [vmem:[%s2750_s2 + $0xd0] sm:$0xff]   ;;  %v2248_v51 = vld [vmem:[%s2750_s2 + $0xd8] sm:$0xff]   ;;  %v2249_v52 = vld [vmem:[%s2750_s2 + $0xe0] sm:$0xff]  }
  0x38   : > { %2105 = vmatprep.subr.bf16.mxu0 %v2365_v6  ;;  %v2250_v53 = vld [vmem:[%s2750_s2 + $0xe8] sm:$0xff]   ;;  %v2251_v54 = vld [vmem:[%s2750_s2 + $0xf0] sm:$0xff]  }
  0x39   : > { %v287_v0 = vadd.f32 %v286_v63, %v285_v62 }
  0x3b   : > { %2107 = vmatpush3.bf16.msra.mxu0 %v2106_v55  ;;  %v288_v1 = vrot.slane %v287_v0, 1  ;;  %v2252_v55 = vld [vmem:[%s2750_s2 + $0xf8] sm:$0xff]  }
  0x3c   : > { %2108 = vmatprep.subr.bf16.mxu0 %v2365_v6 }
  0x3d   : > { %v289_v2 = vadd.f32 %v288_v1, %v287_v0 }
  0x3e   : > { %1984 = vmatmul.mubr.f32.vlgmr.msra.gmra.mrb[0].mxu0 %v2497_v14 }
  0x3f   : > { %2110 = vmatpush3.bf16.msra.mxu0 %v2109_v56  ;;  %1994 = vmatprep.mubr.msk.f32.mxu0 %vm2366_vm0, %v2367_v8  ;;  %v290_v3 = vmax.f32 %v289_v2, 1e-24  ;;  %v2255_v56 = vld [vmem:[%s2751_s3 + $0x4] ss:$16 sps:$4 sm:$0xff]  }
  0x40   : > { %2111 = vmatprep.subr.bf16.mxu0 %v2365_v6 }
  0x41   : > { %2265 = vrsqrt.f32 %v290_v3 }
  0x43   : > { %2113 = vmatpush3.bf16.msra.mxu0 %v2112_v57 }
  0x44   : > { %2114 = vmatprep.subr.bf16.mxu0 %v2365_v6 }
  0x46   : > { %1995 = vmatmul.mubr.f32.vlgmr.msra.gmra.mrb[0].mxu0 %v2500_v17  ;;  %v2368_v17 = vmov 65535  }
  0x47   : > { %2116 = vmatpush3.bf16.msra.mxu0 %v2097_v31  ;;  %2005 = vmatprep.mubr.msk.f32.mxu0 %vm2366_vm0, %v2367_v8  ;;  %v1119_v18 = vsel %vm1117_vm5, 4294967295, %v2368_v17 }
  0x48   : > { %2117 = vmatprep.subr.bf16.mxu0 %v2365_v6  ;;  %v1120_v21 = vsel %vm1118_vm6, %v1119_v18, 0 }
  0x4b   : > { %2119 = vmatpush3.bf16.msra.mxu0 %v2100_v38  ;;  %v2266_v4 = vpop.eup %2265 }
  0x4c   : > { %2120 = vmatprep.subr.bf16.mxu0 %v2365_v6 }
  0x4e   : > { %2006 = vmatmul.mubr.f32.vlgmr.msra.gmra.mrb[0].mxu0 %v368_v36  ;;  %v2233_v36 = vld [vmem:[%s2750_s2 + $0x60] sm:$0xff]  }
  0x4f   : > { %2122 = vmatpush3.bf16.msra.mxu0 %v2121_v58  ;;  %2016 = vmatprep.mubr.msk.f32.mxu0 %vm2366_vm0, %v2367_v8 }
  0x50   : > { %2123 = vmatprep.subr.bf16.mxu0 %v2365_v6 }
  0x53   : > { %2125 = vmatpush3.bf16.msra.mxu0 %v2124_v59 }
  0x54   : > { %2126 = vmatprep.subr.bf16.mxu0 %v2365_v6 }
  0x56   : > { %2017 = vmatmul.mubr.f32.vlgmr.msra.gmra.mrb[0].mxu0 %v2497_v14 }
  0x57   : > { %2128 = vmatpush3.bf16.msra.mxu0 %v2097_v31  ;;  %2027 = vmatprep.mubr.msk.f32.mxu0 %vm2366_vm0, %v2367_v8  ;;  %v2228_v31 = vld [vmem:[%s2750_s2 + $0x38] sm:$0xff]  }
  0x58   : > { %2129 = vmatprep.subr.bf16.mxu0 %v2365_v6 }
  0x5b   : > { %2131 = vmatpush3.bf16.msra.mxu0 %v2100_v38  ;;  %v2235_v38 = vld [vmem:[%s2750_s2 + $0x70] sm:$0xff]  }
  0x5e   : > { %2028 = vmatmul.mubr.f32.vlgmr.msra.gmra.mrb[0].mxu0 %v2497_v14 }
  0x5f   : > { %1589 = vmatprep.mubr.bf16.mxu0 %v2255_v56 }
 0x131   : > { %v778_v5 = vpop.f32.mrb[0].mxu0 }
 0x132   : > { %v782_v6 = vmul.f32 %v2266_v4, %v778_v5  ;;  %v2029_v7 = vpop.f32.mrb[1].mxu0 }
 0x134   : > { %vm783_vm4 = vcmp.gt.f32.partialorder %v782_v6, 0.2 }
 0x135   : > { %v784_v8 = vsel %vm783_vm4, %v778_v5, 0.0 }
 0x136   : > { %v785_v9 = vand.u32 2147483647, %v784_v8 }
 0x138   : > { %v786_v10 = vrot.slane %v785_v9, 4 }
 0x13a   : > { %v787_v11 = vadd.f32 %v786_v10, %v785_v9 }
 0x13c   : > { %v788_v12 = vrot.slane %v787_v11, 2 }
 0x13e   : > { %v789_v13 = vadd.f32 %v788_v12, %v787_v11 }
 0x140   : > { %v790_v14 = vrot.slane %v789_v13, 1 }
 0x142   : > { %v791_v15 = vadd.f32 %v790_v14, %v789_v13 }
 0x144   : > { %v792_v16 = vmax.f32 %v791_v15, 1e-12 }
 0x146   : > { %2267 = vrcp.f32 %v792_v16 }
 0x150   : > { %v2268_v19 = vpop.eup %2267 }
 0x151   : > { %v794_v20 = vmul.f32 %v2268_v19, %v784_v8 }
 0x153   : > { %v795_v23 = vpack.c.bf16 %v2369_v22, %v794_v20 }
 0x155   : > { %v1122_v24 = vand.u32 %v1120_v21, %v795_v23 }
 0x157   : > { %2030 = vmatprep.subr.bf16.mxu1 %v1122_v24 }
 0x158   : > { %2031 = vmatpush3.bf16.msra.mxu1 %v1122_v24 }
 0x15b   : > { %2033 = vmatmul.mubr.msk.bf16.vlgmr.msra.gmra.mrb[0].mxu1 %vm1020_vm3, %v2222_v25 }
 0x15c   : > { %2036 = vmatprep.mubr.msk.bf16.mxu1 %vm1020_vm3, %v2223_v26 }
 0x163   : > { %2037 = vmatmul.mubr.msk.bf16.gmra.mrb[4].mxu1 %vm1020_vm3, %v2224_v27 }
 0x164   : > { %2040 = vmatprep.mubr.msk.bf16.mxu1 %vm1020_vm3, %v2225_v28 }
 0x16b   : > { %2041 = vmatmul.mubr.msk.bf16.gmra.mrb[8].mxu1 %vm1020_vm3, %v2226_v29 }
 0x16c   : > { %2044 = vmatprep.mubr.msk.bf16.mxu1 %vm1020_vm3, %v2227_v30 }
 0x173   : > { %2045 = vmatmul.mubr.msk.bf16.gmra.mrb[12].mxu1 %vm1020_vm3, %v2228_v31 }
 0x174   : > { %2048 = vmatprep.mubr.msk.bf16.mxu1 %vm1020_vm3, %v2229_v32 }
 0x17b   : > { %2049 = vmatmul.mubr.msk.bf16.gmra.mrb[16].mxu1 %vm1020_vm3, %v2230_v33 }
 0x17c   : > { %2052 = vmatprep.mubr.msk.bf16.mxu1 %vm1020_vm3, %v2231_v34 }
 0x183   : > { %2053 = vmatmul.mubr.msk.bf16.gmra.mrb[20].mxu1 %vm1020_vm3, %v2232_v35 }
 0x184   : > { %2056 = vmatprep.mubr.msk.bf16.mxu1 %vm1020_vm3, %v2233_v36 }
 0x18b   : > { %2057 = vmatmul.mubr.msk.bf16.gmra.mrb[24].mxu1 %vm1020_vm3, %v2234_v37 }
 0x18c   : > { %2060 = vmatprep.mubr.msk.bf16.mxu1 %vm1020_vm3, %v2235_v38 }
 0x193   : > { %2061 = vmatmul.mubr.msk.bf16.gmra.mrb[28].mxu1 %vm1020_vm3, %v2236_v39 }
 0x194   : > { %2064 = vmatprep.mubr.msk.bf16.mxu1 %vm1020_vm3, %v2237_v40 }
 0x19b   : > { %2065 = vmatmul.mubr.msk.bf16.gmra.mrb[32].mxu1 %vm1020_vm3, %v2238_v41 }
 0x19c   : > { %2068 = vmatprep.mubr.msk.bf16.mxu1 %vm1020_vm3, %v2239_v42 }
 0x1a3   : > { %2069 = vmatmul.mubr.msk.bf16.gmra.mrb[36].mxu1 %vm1020_vm3, %v2240_v43 }
 0x1a4   : > { %2072 = vmatprep.mubr.msk.bf16.mxu1 %vm1020_vm3, %v2241_v44 }
 0x1ab   : > { %2073 = vmatmul.mubr.msk.bf16.gmra.mrb[40].mxu1 %vm1020_vm3, %v2242_v45 }
 0x1ac   : > { %2076 = vmatprep.mubr.msk.bf16.mxu1 %vm1020_vm3, %v2243_v46 }
 0x1b3   : > { %2077 = vmatmul.mubr.msk.bf16.gmra.mrb[44].mxu1 %vm1020_vm3, %v2244_v47 }
 0x1b4   : > { %2080 = vmatprep.mubr.msk.bf16.mxu1 %vm1020_vm3, %v2245_v48 }
 0x1bb   : > { %2081 = vmatmul.mubr.msk.bf16.gmra.mrb[48].mxu1 %vm1020_vm3, %v2246_v49 }
 0x1bc   : > { %2084 = vmatprep.mubr.msk.bf16.mxu1 %vm1020_vm3, %v2247_v50 }
 0x1c3   : > { %2085 = vmatmul.mubr.msk.bf16.gmra.mrb[52].mxu1 %vm1020_vm3, %v2248_v51 }
 0x1c4   : > { %2088 = vmatprep.mubr.msk.bf16.mxu1 %vm1020_vm3, %v2249_v52 }
 0x1cb   : > { %2089 = vmatmul.mubr.msk.bf16.gmra.mrb[56].mxu1 %vm1020_vm3, %v2250_v53 }
 0x1cc   : > { %2092 = vmatprep.mubr.msk.bf16.mxu1 %vm1020_vm3, %v2251_v54 }
 0x1d3   : > { %2093 = vmatmul.mubr.msk.bf16.gmra.mrb[60].mxu1 %vm1020_vm3, %v2252_v55 }
 0x22e   : > { %v2034_v57 = vpop.f32.mrb[0].mxu1 }
 0x22f   : > { %v1158_v58 = vpop.f32.mrb[1].mxu1  ;;  %v1415_v60 = vmax.f32 %v2034_v57, 0.0 }
 0x230   : > { %v2035_v59 = vpop.f32.mrb[2].mxu1  ;;  %v1413_v63 = vmax.f32 %v1158_v58, 0.0 }
 0x231   : > { %v1416_v61 = vmax.f32 %v2035_v59, 0.0  ;;  %v1161_v62 = vpop.f32.mrb[3].mxu1 }
 0x232   : > { %v1414_v0 = vmax.f32 %v1161_v62, 0.0 }
 0x233   : > { %v1478_v1 = vpack.c.bf16 %v1416_v61, %v1415_v60 }
 0x234   : > { %v1477_v2 = vpack.c.bf16 %v1414_v0, %v1413_v63 }
 0x236   : > { %v2038_v3 = vpop.f32.mrb[4].mxu1 }
 0x237   : > { %v1174_v4 = vpop.f32.mrb[5].mxu1  ;;  %v1419_v6 = vmax.f32 %v2038_v3, 0.0 }
 0x238   : > { %v2039_v5 = vpop.f32.mrb[6].mxu1  ;;  %v1417_v9 = vmax.f32 %v1174_v4, 0.0 }
 0x239   : > { %v1420_v7 = vmax.f32 %v2039_v5, 0.0  ;;  %v1177_v8 = vpop.f32.mrb[7].mxu1 }
 0x23a   : > { %v1418_v10 = vmax.f32 %v1177_v8, 0.0 }
 0x23b   : > { %v1480_v11 = vpack.c.bf16 %v1420_v7, %v1419_v6 }
 0x23c   : > { %v1479_v12 = vpack.c.bf16 %v1418_v10, %v1417_v9 }
 0x23e   : > { %v2042_v13 = vpop.f32.mrb[8].mxu1 }
 0x23f   : > { %v1190_v14 = vpop.f32.mrb[9].mxu1  ;;  %v1423_v16 = vmax.f32 %v2042_v13, 0.0 }
 0x240   : > { %v2043_v15 = vpop.f32.mrb[10].mxu1  ;;  %v1421_v19 = vmax.f32 %v1190_v14, 0.0 }
 0x241   : > { %v1424_v17 = vmax.f32 %v2043_v15, 0.0  ;;  %v1193_v18 = vpop.f32.mrb[11].mxu1 }
 0x242   : > { %v1422_v20 = vmax.f32 %v1193_v18, 0.0 }
 0x243   : > { %v1482_v21 = vpack.c.bf16 %v1424_v17, %v1423_v16  ;;  %v2253_v17 = vld [vmem:[%s2751_s3] ss:$16 sps:$4 sm:$0xff]  }
 0x244   : > { %v1481_v22 = vpack.c.bf16 %v1422_v20, %v1421_v19  ;;  %v2256_v19 = vld [vmem:[%s2751_s3 + $0x24] ss:$16 sps:$4 sm:$0xff]  }
 0x246   : > { %v2046_v23 = vpop.f32.mrb[12].mxu1 }
 0x247   : > { %v1206_v24 = vpop.f32.mrb[13].mxu1  ;;  %v1427_v26 = vmax.f32 %v2046_v23, 0.0 }
 0x248   : > { %v2047_v25 = vpop.f32.mrb[14].mxu1  ;;  %v1425_v29 = vmax.f32 %v1206_v24, 0.0 }
 0x249   : > { %v1428_v27 = vmax.f32 %v2047_v25, 0.0  ;;  %v1209_v28 = vpop.f32.mrb[15].mxu1 }
 0x24a   : > { %v1426_v30 = vmax.f32 %v1209_v28, 0.0 }
 0x24b   : > { %v2660_v31 = vpack.c.bf16 %v1428_v27, %v1427_v26 }
 0x24c   : > { %v1483_v32 = vpack.c.bf16 %v1426_v30, %v1425_v29  ;;  %v2258_v29 = vld [vmem:[%s2751_s3 + $0x20] ss:$16 sps:$4 sm:$0xff]  }
 0x24e   : > { %v2050_v33 = vpop.f32.mrb[16].mxu1 }
 0x24f   : > { %v1222_v34 = vpop.f32.mrb[17].mxu1  ;;  %v1431_v36 = vmax.f32 %v2050_v33, 0.0 }
 0x250   : > { %v2051_v35 = vpop.f32.mrb[18].mxu1  ;;  %v1429_v39 = vmax.f32 %v1222_v34, 0.0 }
 0x251   : > { %v1432_v37 = vmax.f32 %v2051_v35, 0.0  ;;  %v1225_v38 = vpop.f32.mrb[19].mxu1 }
 0x252   : > { %v1430_v40 = vmax.f32 %v1225_v38, 0.0 }
 0x253   : > { %v1486_v41 = vpack.c.bf16 %v1432_v37, %v1431_v36 }
 0x254   : > { %v1485_v42 = vpack.c.bf16 %v1430_v40, %v1429_v39 }
 0x256   : > { %v2054_v43 = vpop.f32.mrb[20].mxu1  ;;  %1908 = vmatprep.subr.bf16.mxu0 %v1485_v42 }
 0x257   : > { %v1238_v44 = vpop.f32.mrb[21].mxu1  ;;  %1909 = vmatpush3.bf16.msra.mxu0 %v1477_v2  ;;  %v1435_v46 = vmax.f32 %v2054_v43, 0.0 }
 0x258   : > { %v2055_v45 = vpop.f32.mrb[22].mxu1  ;;  %1910 = vmatprep.subr.bf16.mxu0 %v1486_v41  ;;  %v1433_v49 = vmax.f32 %v1238_v44, 0.0 }
 0x259   : > { %v1436_v47 = vmax.f32 %v2055_v45, 0.0  ;;  %v1241_v48 = vpop.f32.mrb[23].mxu1 }
 0x25a   : > { %v1434_v50 = vmax.f32 %v1241_v48, 0.0 }
 0x25b   : > { %v1488_v51 = vpack.c.bf16 %v1436_v47, %v1435_v46  ;;  %1911 = vmatpush3.bf16.msra.mxu0 %v1478_v1 }
 0x25c   : > { %v1487_v52 = vpack.c.bf16 %v1434_v50, %v1433_v49 }
 0x25e   : > { %v2058_v53 = vpop.f32.mrb[24].mxu1  ;;  %1912 = vmatprep.subr.bf16.mxu0 %v1487_v52 }
 0x25f   : > { %v1254_v54 = vpop.f32.mrb[25].mxu1  ;;  %1913 = vmatpush3.bf16.msra.mxu0 %v1479_v12  ;;  %v1439_v56 = vmax.f32 %v2058_v53, 0.0 }
 0x260   : > { %v2059_v55 = vpop.f32.mrb[26].mxu1  ;;  %1914 = vmatprep.subr.bf16.mxu0 %v1488_v51  ;;  %v1437_v59 = vmax.f32 %v1254_v54, 0.0 }
 0x261   : > { %v1440_v57 = vmax.f32 %v2059_v55, 0.0  ;;  %v1257_v58 = vpop.f32.mrb[27].mxu1 }
 0x262   : > { %v1438_v60 = vmax.f32 %v1257_v58, 0.0 }
 0x263   : > { %v1490_v61 = vpack.c.bf16 %v1440_v57, %v1439_v56  ;;  %1915 = vmatpush3.bf16.msra.mxu0 %v1480_v11 }
 0x264   : > { %v1489_v62 = vpack.c.bf16 %v1438_v60, %v1437_v59 }
 0x266   : > { %v2062_v63 = vpop.f32.mrb[28].mxu1  ;;  %1916 = vmatprep.subr.bf16.mxu0 %v1489_v62 }
 0x267   : > { %v1270_v0 = vpop.f32.mrb[29].mxu1  ;;  %1917 = vmatpush3.bf16.msra.mxu0 %v1481_v22  ;;  %v1443_v2 = vmax.f32 %v2062_v63, 0.0 }
 0x268   : > { %v2063_v1 = vpop.f32.mrb[30].mxu1  ;;  %1918 = vmatprep.subr.bf16.mxu0 %v1490_v61  ;;  %v1441_v5 = vmax.f32 %v1270_v0, 0.0 }
 0x269   : > { %v1444_v3 = vmax.f32 %v2063_v1, 0.0  ;;  %v1273_v4 = vpop.f32.mrb[31].mxu1 }
 0x26a   : > { %v1442_v6 = vmax.f32 %v1273_v4, 0.0 }
 0x26b   : > { %v1492_v7 = vpack.c.bf16 %v1444_v3, %v1443_v2  ;;  %1919 = vmatpush3.bf16.msra.mxu0 %v1482_v21 }
 0x26c   : > { %v1491_v8 = vpack.c.bf16 %v1442_v6, %v1441_v5 }
 0x26e   : > { %v2066_v9 = vpop.f32.mrb[32].mxu1  ;;  %1920 = vmatprep.subr.bf16.mxu0 %v1491_v8 }
 0x26f   : > { %v1286_v10 = vpop.f32.mrb[33].mxu1  ;;  %1921 = vmatpush3.bf16.msra.mxu0 %v1483_v32  ;;  %v1447_v12 = vmax.f32 %v2066_v9, 0.0 }
 0x270   : > { %v2067_v11 = vpop.f32.mrb[34].mxu1  ;;  %1922 = vmatprep.subr.bf16.mxu0 %v1492_v7  ;;  %v1445_v15 = vmax.f32 %v1286_v10, 0.0 }
 0x271   : > { %v1448_v13 = vmax.f32 %v2067_v11, 0.0  ;;  %v1289_v14 = vpop.f32.mrb[35].mxu1 }
 0x272   : > { %v1446_v16 = vmax.f32 %v1289_v14, 0.0 }
 0x273   : > { %v1494_v18 = vpack.c.bf16 %v1448_v13, %v1447_v12  ;;  %1923 = vmatpush3.bf16.msra.mxu0 %v2660_v31  ;;  %v2261_v31 = vld [vmem:[%s2751_s3 + $0xc] ss:$16 sps:$4 sm:$0xff]  }
 0x274   : > { %v1493_v20 = vpack.c.bf16 %v1446_v16, %v1445_v15 }
 0x276   : > { %v2070_v21 = vpop.f32.mrb[36].mxu1  ;;  %1590 = vmatmul.mubr.bf16.vlgmr.msra.gmra.mrb[4].mxu0 %v2253_v17 }
 0x277   : > { %v1302_v22 = vpop.f32.mrb[37].mxu1  ;;  %1597 = vmatprep.mubr.bf16.mxu0 %v2256_v19  ;;  %v1451_v24 = vmax.f32 %v2070_v21, 0.0 }
 0x278   : > { %v2071_v23 = vpop.f32.mrb[38].mxu1  ;;  %v1449_v27 = vmax.f32 %v1302_v22, 0.0 }
 0x279   : > { %v1452_v25 = vmax.f32 %v2071_v23, 0.0  ;;  %v1305_v26 = vpop.f32.mrb[39].mxu1 }
 0x27a   : > { %v1450_v28 = vmax.f32 %v1305_v26, 0.0 }
 0x27b   : > { %v1496_v30 = vpack.c.bf16 %v1452_v25, %v1451_v24 }
 0x27c   : > { %v1495_v32 = vpack.c.bf16 %v1450_v28, %v1449_v27 }
 0x27e   : > { %v2074_v33 = vpop.f32.mrb[40].mxu1  ;;  %1598 = vmatmul.mubr.bf16.gmra.mrb[8].mxu0 %v2258_v29  ;;  %v2259_v29 = vld [vmem:[%s2751_s3 + $0x8] ss:$16 sps:$4 sm:$0xff]  }
 0x27f   : > { %v1318_v34 = vpop.f32.mrb[41].mxu1  ;;  %1638 = vmatprep.mubr.bf16.mxu0 %v2261_v31  ;;  %v1455_v36 = vmax.f32 %v2074_v33, 0.0  ;;  %v2264_v31 = vld [vmem:[%s2751_s3 + $0x28] ss:$16 sps:$4 sm:$0xff]  }
 0x280   : > { %v2075_v35 = vpop.f32.mrb[42].mxu1  ;;  %v1453_v39 = vmax.f32 %v1318_v34, 0.0 }
 0x281   : > { %v1456_v37 = vmax.f32 %v2075_v35, 0.0  ;;  %v1321_v38 = vpop.f32.mrb[43].mxu1 }
 0x282   : > { %v1454_v40 = vmax.f32 %v1321_v38, 0.0 }
 0x283   : > { %v1498_v41 = vpack.c.bf16 %v1456_v37, %v1455_v36 }
 0x284   : > { %v1497_v42 = vpack.c.bf16 %v1454_v40, %v1453_v39 }
 0x286   : > { %v2078_v43 = vpop.f32.mrb[44].mxu1 }
 0x287   : > { %v1334_v44 = vpop.f32.mrb[45].mxu1  ;;  %v1459_v46 = vmax.f32 %v2078_v43, 0.0 }
 0x288   : > { %v2079_v45 = vpop.f32.mrb[46].mxu1  ;;  %v1457_v49 = vmax.f32 %v1334_v44, 0.0 }
 0x289   : > { %v1460_v47 = vmax.f32 %v2079_v45, 0.0  ;;  %v1337_v48 = vpop.f32.mrb[47].mxu1 }
 0x28a   : > { %v1458_v50 = vmax.f32 %v1337_v48, 0.0 }
 0x28b   : > { %v1500_v51 = vpack.c.bf16 %v1460_v47, %v1459_v46 }
 0x28c   : > { %v1499_v52 = vpack.c.bf16 %v1458_v50, %v1457_v49 }
 0x28e   : > { %v2082_v53 = vpop.f32.mrb[48].mxu1 }
 0x28f   : > { %v1350_v54 = vpop.f32.mrb[49].mxu1  ;;  %v1463_v56 = vmax.f32 %v2082_v53, 0.0 }
 0x290   : > { %v2083_v55 = vpop.f32.mrb[50].mxu1  ;;  %v1461_v59 = vmax.f32 %v1350_v54, 0.0 }
 0x291   : > { %v1464_v57 = vmax.f32 %v2083_v55, 0.0  ;;  %v1353_v58 = vpop.f32.mrb[51].mxu1 }
 0x292   : > { %v1462_v60 = vmax.f32 %v1353_v58, 0.0 }
 0x293   : > { %v1502_v61 = vpack.c.bf16 %v1464_v57, %v1463_v56 }
 0x294   : > { %v1501_v62 = vpack.c.bf16 %v1462_v60, %v1461_v59 }
 0x296   : > { %v2086_v63 = vpop.f32.mrb[52].mxu1  ;;  %1936 = vmatprep.subr.bf16.mxu0 %v1501_v62 }
 0x297   : > { %v1366_v0 = vpop.f32.mrb[53].mxu1  ;;  %1937 = vmatpush3.bf16.msra.mxu0 %v1493_v20  ;;  %v1467_v2 = vmax.f32 %v2086_v63, 0.0 }
 0x298   : > { %v2087_v1 = vpop.f32.mrb[54].mxu1  ;;  %1938 = vmatprep.subr.bf16.mxu0 %v1502_v61  ;;  %v1465_v5 = vmax.f32 %v1366_v0, 0.0 }
 0x299   : > { %v1468_v3 = vmax.f32 %v2087_v1, 0.0  ;;  %v1369_v4 = vpop.f32.mrb[55].mxu1 }
 0x29a   : > { %v1466_v6 = vmax.f32 %v1369_v4, 0.0 }
 0x29b   : > { %v1504_v7 = vpack.c.bf16 %v1468_v3, %v1467_v2  ;;  %1939 = vmatpush3.bf16.msra.mxu0 %v1494_v18 }
 0x29c   : > { %v1503_v8 = vpack.c.bf16 %v1466_v6, %v1465_v5 }
 0x29e   : > { %v2090_v9 = vpop.f32.mrb[56].mxu1  ;;  %1940 = vmatprep.subr.bf16.mxu0 %v1503_v8 }
 0x29f   : > { %v1382_v10 = vpop.f32.mrb[57].mxu1  ;;  %1941 = vmatpush3.bf16.msra.mxu0 %v1495_v32  ;;  %v1471_v12 = vmax.f32 %v2090_v9, 0.0 }
 0x2a0   : > { %v2091_v11 = vpop.f32.mrb[58].mxu1  ;;  %1942 = vmatprep.subr.bf16.mxu0 %v1504_v7  ;;  %v1469_v15 = vmax.f32 %v1382_v10, 0.0 }
 0x2a1   : > { %v1472_v13 = vmax.f32 %v2091_v11, 0.0  ;;  %v1385_v14 = vpop.f32.mrb[59].mxu1 }
 0x2a2   : > { %v1470_v16 = vmax.f32 %v1385_v14, 0.0 }
 0x2a3   : > { %v1506_v17 = vpack.c.bf16 %v1472_v13, %v1471_v12  ;;  %1943 = vmatpush3.bf16.msra.mxu0 %v1496_v30  ;;  %v2262_v30 = vld [vmem:[%s2751_s3 + $0x2c] ss:$16 sps:$4 sm:$0xff]  }
 0x2a4   : > { %v1505_v19 = vpack.c.bf16 %v1470_v16, %v1469_v15 }
 0x2a6   : > { %v2094_v20 = vpop.f32.mrb[60].mxu1  ;;  %1944 = vmatprep.subr.bf16.mxu0 %v1505_v19 }
 0x2a7   : > { %v1398_v21 = vpop.f32.mrb[61].mxu1  ;;  %1945 = vmatpush3.bf16.msra.mxu0 %v1497_v42  ;;  %v1475_v22 = vmax.f32 %v2094_v20, 0.0 }
 0x2a8   : > { %v2095_v18 = vpop.f32.mrb[62].mxu1  ;;  %1946 = vmatprep.subr.bf16.mxu0 %v1506_v17  ;;  %v1473_v25 = vmax.f32 %v1398_v21, 0.0 }
 0x2a9   : > { %v1476_v23 = vmax.f32 %v2095_v18, 0.0  ;;  %v1401_v24 = vpop.f32.mrb[63].mxu1 }
 0x2aa   : > { %v1474_v26 = vmax.f32 %v1401_v24, 0.0 }
 0x2ab   : > { %v1508_v27 = vpack.c.bf16 %v1476_v23, %v1475_v22  ;;  %1947 = vmatpush3.bf16.msra.mxu0 %v1498_v41 }
 0x2ac   : > { %v1507_v28 = vpack.c.bf16 %v1474_v26, %v1473_v25 }
 0x2ae   : > { %1948 = vmatprep.subr.bf16.mxu0 %v1507_v28 }
 0x2af   : > { %1949 = vmatpush3.bf16.msra.mxu0 %v1499_v52 }
 0x2b0   : > { %1950 = vmatprep.subr.bf16.mxu0 %v1508_v27 }
 0x2b3   : > { %1951 = vmatpush3.bf16.msra.mxu0 %v1500_v51 }
 0x2b6   : > { %1639 = vmatmul.mubr.bf16.vlgmr.msra.gmra.mrb[12].mxu0 %v2259_v29 }
 0x2b7   : > { %1646 = vmatprep.mubr.bf16.mxu0 %v2262_v30 }
 0x2be   : > { %1647 = vmatmul.mubr.bf16.gmra.mrb[16].mxu0 %v2264_v31 }
 0x349   : > { %v1924_v32 = vpop.f32.mrb[4].mxu0 }
 0x34a   : > { %v1925_v33 = vpop.f32.mrb[5].mxu0 }
 0x34b   : > { %v1926_v34 = vadd.f32 %v1925_v33, %v1924_v32  ;;  %v1927_v35 = vpop.f32.mrb[6].mxu0 }
 0x34c   : > { %v1928_v36 = vpop.f32.mrb[7].mxu0 }
 0x34d   : > { %v1929_v37 = vadd.f32 %v1928_v36, %v1927_v35 }
 0x351   : > { %v1930_v38 = vpop.f32.mrb[8].mxu0 }
 0x352   : > { %v1931_v39 = vpop.f32.mrb[9].mxu0 }
 0x353   : > { %v1932_v40 = vadd.f32 %v1931_v39, %v1930_v38  ;;  %v1933_v41 = vpop.f32.mrb[10].mxu0 }
 0x354   : > { %v1934_v42 = vpop.f32.mrb[11].mxu0 }
 0x355   : > { %v1935_v43 = vadd.f32 %v1934_v42, %v1933_v41 }
 0x389   : > { %v1952_v44 = vpop.f32.mrb[12].mxu0 }
 0x38a   : > { %v1953_v45 = vpop.f32.mrb[13].mxu0 }
 0x38b   : > { %v1954_v46 = vadd.f32 %v1953_v45, %v1952_v44  ;;  %v1955_v47 = vpop.f32.mrb[14].mxu0 }
 0x38c   : > { %v1956_v48 = vpop.f32.mrb[15].mxu0 }
 0x38d   : > { %v1641_v49 = vadd.f32 %v1954_v46, %v1926_v34  ;;  %v1957_v50 = vadd.f32 %v1956_v48, %v1955_v47 }
 0x38f   : > { %1655 = vst [vmem:[%s259_s23] sm:$0xff] %v1641_v49  ;;  %v1644_v51 = vadd.f32 %v1957_v50, %v1929_v37 }
 0x391   : > { %1656 = vst [vmem:[%s259_s23 + $0x8] sm:$0xff] %v1644_v51  ;;  %v1958_v52 = vpop.f32.mrb[16].mxu0 }
 0x392   : > { %v1959_v53 = vpop.f32.mrb[17].mxu0 }
 0x393   : > { %v1960_v54 = vadd.f32 %v1959_v53, %v1958_v52  ;;  %v1961_v55 = vpop.f32.mrb[18].mxu0 }
 0x394   : > { %v1962_v56 = vpop.f32.mrb[19].mxu0 }
 0x395   : > { %v1649_v57 = vadd.f32 %v1960_v54, %v1932_v40  ;;  %v1963_v58 = vadd.f32 %v1962_v56, %v1961_v55 }
 0x397   : > { %1657 = vst [vmem:[%s259_s23 + $0x10] sm:$0xff] %v1649_v57  ;;  %v1652_v59 = vadd.f32 %v1963_v58, %v1935_v43 }
 0x399   : > { %1658 = vst [vmem:[%s259_s23 + $0x18] sm:$0xff] %v1652_v59 }
 0x39a   : > { %2282 = shalt.err (!%p2279_p7)
}
 0x39b   : > { %s2283_s28 = scalar_lea.hbm %s2692_s18, 512  ;;  %s2287_s23 = scalar_lea.hbm %s2752_s4, 2048 }
 0x39c   : > { %p2284_p10 = scmp.ne.s32.totalorder %s2692_s18, %s2283_s28  ;;  %p2288_p13 = scmp.lt.u32.totalorder %s2692_s18, %s2752_s4 }
 0x39d   : > { %p2289_p0 = scmp.lt.u32.totalorder %s2287_s23, %s2283_s28  ;;  %p2291_p2 = scmp.lt.u32.totalorder %s2283_s28, %s2692_s18 }
 0x39e   : > { %p2285_p11 = pnand %p2284_p10, %p2459_p8 }
 0x39f   : > { %p2290_p1 = por %p2289_p0, %p2288_p13 }
 0x3a0   : > { %p2286_p12 = pneg %p2285_p11 }
 0x3a1   : > { %p2292_p3 = por %p2291_p2, %p2290_p1 }
 0x3a3   : > { %p2293_p4 = pnand %p2292_p3, %p2286_p12 }
 0x3a5   : > { %2296 = shalt.err (!%p2293_p4)
}
 0x3a6   : > { %s2371_s19 = smov 128   ;;  %s2372_s9 = smov 256  }
 0x3a7   : > { %s2373_s7 = smov 8  }
 0x3a8   : > { %2142 = dma.vmem_to_hbm [thread:$0]  (%p2459_p8), %s2687_s27, 512, %s2692_s18, %s2696_s6, %s2371_s19, %s2372_s9, %s2373_s7  }
 0x3a9 PF: > { %p2148_p5 = scmp.ge.s32.totalorder %s2363_s22, 2  ;;  %s1689_s10 = sand.u32 1, %s2335_s15  }
 0x3aa   : > { %s1690_s11 = scalar_lea.sflag [#allocation4], %s1689_s10 }
 0x3ab   : > { %p2145_p6 = pnand %p2148_p5, %p2463_p9 }
 0x3ad   : > { %2330 = dma.done.wait (!%p2145_p6), %s1690_s11, 512  }
 0x3ae   : > { %2332 = vsyncadd (!%p2145_p6), %s1690_s11, 4294966784  ;;  %s17_s22 = sadd.s32 1, %s2363_s22   ;;  %s2756_s15 = smov %s2339_s16 }
 0x3af   : > { %p14_p7 = scmp.ge.s32.totalorder %s17_s22, 6   ;;  %s2757_s16 = smov %s2343_s17 }
 0x3b0   : > { %s2758_s17 = smov %s2471_s8  ;;  %s2759_s18 = smov %s2355_s20 }
 0x3b1   : > { %s2760_s19 = smov %s2359_s21  ;;  %s2761_s20 = smov %s2764_s25 }
 0x3b2   : > { %s2762_s21 = smov %s2768_s26  ;;  %16 = sbr.rel (!%p14_p7) target bundleno = 5 (0x5), region = 114 }
 0x3b9   :  { %1695 = vsyncpa [#allocation4], 1 }
 0x3ba   :  { %1697 = vsyncpa [#allocation4 + $0x1], 1 }

</bundles_post_ra>
